<compile_context>
chip_gen: v5e
topology: v5e:2x2
jax: 0.10.0
libtpu: 0.0.40
codegen_flags: <defaults>
</compile_context>

<pallas_src>
import functools

import jax
import jax.numpy as jnp
from jax.experimental import pallas as pl
from jax.experimental.pallas import tpu as pltpu


def _add_index_offset_kernel(x_ref, o_ref, *, rows_per_block):
    # Grid position along the (flattened) batch axis.
    bi = pl.program_id(0)
    bt = x_ref.shape[0]
    # Per-row offset: 2 * (global_row + 1), shaped (Bt, 1) so the broadcast
    # happens inside the single elementwise add.
    rows = jax.lax.broadcasted_iota(jnp.int32, (bt, 1), 0)
    offs = (2 * (bi * rows_per_block + rows + 1)).astype(x_ref.dtype)
    o_ref[...] = x_ref[...] + offs


def _choose_tiles(B, F, itemsize):
    """Pick (Bt, Ft): lane-dense, up to ~4 MiB per buffer, prefer exact divisors."""
    # Lane-axis tile: keep the full extent when modest; otherwise the largest
    # multiple of 128 <= 8192 that divides F evenly (F multiple of 128 case).
    if F % 128 == 0 and F > 8192:
        Ft = 8192
        while F % Ft != 0:
            Ft -= 128  # terminates: F is a multiple of 128
    else:
        Ft = F  # full array extent is always a legal block dim
    # Batch-axis tile: target ~4 MiB per buffer (double-buffered in+out
    # -> ~16 MiB peak, safe on all chips with a 32 MiB scoped limit).
    target_bytes = 4 * 1024 * 1024
    Bt = max(1, target_bytes // max(1, Ft * itemsize))
    if Bt >= B:
        return B, Ft  # single batch tile, full extent
    Bt = max(8, (Bt // 8) * 8)  # sublane dim a multiple of 8
    Bt = min(Bt, B)
    # Prefer an exact divisor of B (avoids a masked remainder block) as long
    # as it stays reasonably large.
    if B % Bt != 0:
        for cand in range(Bt, 7, -8):
            if B % cand == 0:
                Bt = cand
                break
    return Bt, Ft


def pt_module_forward(x):
    """output[i] = x[i] + 2*(i+1); x has shape (B, ...)."""
    B = x.shape[0]
    F = 1
    for d in x.shape[1:]:
        F *= d
    x2d = x.reshape(B, F)

    Bt, Ft = _choose_tiles(B, F, x.dtype.itemsize)
    grid = (pl.cdiv(B, Bt), pl.cdiv(F, Ft))

    kernel = functools.partial(_add_index_offset_kernel, rows_per_block=Bt)

    out2d = pl.pallas_call(
        kernel,
        out_shape=jax.ShapeDtypeStruct((B, F), x.dtype),
        grid_spec=pltpu.PrefetchScalarGridSpec(
            num_scalar_prefetch=0,
            grid=grid,
            in_specs=[
                pl.BlockSpec((Bt, Ft), lambda bi, fi: (bi, fi)),
            ],
            out_specs=pl.BlockSpec((Bt, Ft), lambda bi, fi: (bi, fi)),
        ),
        compiler_params=pltpu.CompilerParams(
            dimension_semantics=("parallel", "parallel"),
            vmem_limit_bytes=32 * 1024 * 1024,
        ),
    )(x2d)

    return out2d.reshape(x.shape)


def _reference(x):
    B = x.shape[0]
    offs = (2.0 * (jnp.arange(B, dtype=x.dtype) + 1)).reshape(
        (B,) + (1,) * (x.ndim - 1)
    )
    return x + offs


if __name__ == "__main__":
    key = jax.random.PRNGKey(0)

    # Small shape consistent with the module's forward (any leading batch dim).
    B, H, W = 4, 8, 128
    x = jax.random.normal(key, (B, H, W), dtype=jnp.float32)
    out = jax.block_until_ready(pt_module_forward(x))
    ref = _reference(x)
    assert out.shape == x.shape and out.dtype == x.dtype
    assert jnp.allclose(out, ref, atol=1e-6), "mismatch vs reference (aligned)"

    # Non-(8,128)-aligned shape to exercise the remainder/full-extent path.
    x2 = jax.random.normal(jax.random.PRNGKey(1), (5, 7, 9), dtype=jnp.float32)
    out2 = jax.block_until_ready(pt_module_forward(x2))
    assert jnp.allclose(out2, _reference(x2), atol=1e-6), "mismatch (unaligned)"

    print("KERNEL_OK")
</pallas_src>

<mosaic_0001>
module attributes {stable_mosaic.version = 11 : i64} {
  func.func @_add_index_offset_kernel(%arg0: i32, %arg1: i32, %arg2: memref<4x1024xf32, #tpu.memory_space<vmem>>, %arg3: memref<4x1024xf32, #tpu.memory_space<vmem>>) attributes {dimension_semantics = [#tpu.dimension_semantics<parallel>, #tpu.dimension_semantics<parallel>], iteration_bounds = array<i64: 1, 1>, scalar_prefetch = 0 : i64, scratch_operands = 0 : i64, tpu.core_type = #tpu.core_type<tc>, window_params = [{transform_indices = @transform_0, window_bounds = array<i64: 4, 1024>}, {transform_indices = @transform_1, window_bounds = array<i64: 4, 1024>}]} {
    %0 = tpu.iota {dimensions = array<i32: 0>} : vector<4x1xi32>
    %c4_i32 = arith.constant 4 : i32
    %1 = arith.muli %arg0, %c4_i32 : i32
    %2 = vector.broadcast %1 : i32 to vector<4x1xi32>
    %3 = arith.addi %2, %0 : vector<4x1xi32>
    %c1_i32 = arith.constant 1 : i32
    %4 = vector.broadcast %c1_i32 : i32 to vector<4x1xi32>
    %5 = arith.addi %3, %4 : vector<4x1xi32>
    %c2_i32 = arith.constant 2 : i32
    %6 = vector.broadcast %c2_i32 : i32 to vector<4x1xi32>
    %7 = arith.muli %6, %5 : vector<4x1xi32>
    %8 = arith.sitofp %7 : vector<4x1xi32> to vector<4x1xf32>
    %c0 = arith.constant 0 : index
    %c0_0 = arith.constant 0 : index
    %9 = vector.load %arg2[%c0, %c0_0] : memref<4x1024xf32, #tpu.memory_space<vmem>>, vector<4x1024xf32>
    %10 = vector.broadcast %8 : vector<4x1xf32> to vector<4x1024xf32>
    %11 = arith.addf %9, %10 : vector<4x1024xf32>
    %c0_1 = arith.constant 0 : index
    %c0_2 = arith.constant 0 : index
    %12 = vector.load %arg3[%c0_1, %c0_2] : memref<4x1024xf32, #tpu.memory_space<vmem>>, vector<4x1024xf32>
    tpu.vector_store %arg3[%c0_1, %c0_2], %11 {strides = array<i32>} : memref<4x1024xf32, #tpu.memory_space<vmem>>, vector<4x1024xf32>,
    return
  }
  func.func @transform_0(%arg0: i32, %arg1: i32) -> (i32, i32) {
    %c0_i32 = arith.constant 0 : i32
    return %arg0, %arg1 : i32, i32
  }
  func.func @transform_1(%arg0: i32, %arg1: i32) -> (i32, i32) {
    %c0_i32 = arith.constant 0 : i32
    return %arg0, %arg1 : i32, i32
  }
}

</mosaic_0001>

<bundles_post_ra>
// kernel: tpu_custom_call.1
= control target key start
LH: loop header
LB: loop body
LE: loop exit
PB: predicated region body
PF: predicated region fallthrough
CT: control target
= control target key end

     0   :  { %6 = vsyncpa [#allocation3], 0  ;;  %s140_s0 = inlined_call_operand.hbm [shape: f32[4,1024], index: 0, kind: input, shape index: {}]   ;;  %s141_s1 = inlined_call_operand.hbm [shape: f32[4,1024], index: 1, kind: output, shape index: {}]  }
   0x1   :  { %7 = vsyncpa [#allocation4], 0  ;;  %s13_s8 = sshll.u32 %s140_s0, 4  ;;  %s121_s9 = smov [#allocation2]   ;;  %s14_s8 = int_to_ptr.hbm [resolvable:$true] %s13_s8 }
   0x2   :  { %s15_s10 = sshll.u32 %s121_s9, 4  ;;  %s16_s10 = int_to_ptr.vmem [resolvable:$true] %s15_s10 }
   0x3   :  { %18 = dma.hbm_to_vmem [thread:$0]  %s14_s8, 512, %s16_s10, [#allocation3]  }
   0x4   :  { %117 = dma.done.wait [#allocation3], 512  }
   0x5   :  { %118 = vsyncadd [#allocation3], 4294966784  ;;  %v23_v0 = vlaneseq  ;;  %v122_v2 = vmov 839922192   ;;  %v31_v8 = vld [vmem:[#allocation2] sm:$0xff]  ;;  %v32_v9 = vld [vmem:[#allocation2 + $0x8] sm:$0xff] }
   0x6   :  { %v37_v3 = vunpack.c.l.s4 %v122_v2  ;;  %v33_v10 = vld [vmem:[#allocation2 + $0x10] sm:$0xff]  ;;  %v34_v12 = vld [vmem:[#allocation2 + $0x18] sm:$0xff]  ;;  %s123_s0 = smov [#allocation5]   ;;  %s56_s14 = sshll.u32 %s141_s1, 4  ;;  %s57_s14 = int_to_ptr.hbm [resolvable:$true] %s56_s14 }
   0x7   :  { %v24_v1 = vshrl.u32 %v23_v0, 7  ;;  %s54_s11 = sshll.u32 %s123_s0, 4  ;;  %s55_s11 = int_to_ptr.vmem [resolvable:$true] %s54_s11 }
   0x8   :  { %v38_v6 = vunpack.c.0.s8 %v37_v3 }
   0x9   :  { %v28_v4 = vadd.s32 1, %v24_v1 }
   0xb   :  { %v29_v5 = vmul.u32 2, %v28_v4 }
   0xd   :  { %v30_v7 = vcvt.s32.f32 %v29_v5 }
   0xf   :  { %v39_v11 = vperm.slane %v30_v7, %v38_v6 }
  0x11   :  { %v41_v13 = vadd.f32 %v39_v11, %v31_v8  ;;  %v42_v14 = vadd.f32 %v39_v11, %v32_v9  ;;  %v43_v15 = vadd.f32 %v39_v11, %v33_v10  ;;  %v44_v16 = vadd.f32 %v39_v11, %v34_v12 }
  0x13   :  { %45 = vst [vmem:[#allocation5] sm:$0xff] %v41_v13 }
  0x14   :  { %46 = vst [vmem:[#allocation5 + $0x8] sm:$0xff] %v42_v14 }
  0x15   :  { %47 = vst [vmem:[#allocation5 + $0x10] sm:$0xff] %v43_v15 }
  0x16   :  { %48 = vst [vmem:[#allocation5 + $0x18] sm:$0xff] %v44_v16 }
  0x17   :  { %59 = dma.vmem_to_hbm [thread:$0]  %s55_s11, 512, %s57_s14, [#allocation4]  }
  0x18   :  { %119 = dma.done.wait [#allocation4], 512  }
  0x19   :  { %120 = vsyncadd [#allocation4], 4294966784 }
  0x1a   :  { %64 = vsyncpa [#allocation3], 1 }
  0x1b   :  { %65 = vsyncpa [#allocation4], 1 }

</bundles_post_ra>
